<compile_context>
chip_gen: v6e
topology: v6e:2x2x1
jax: 0.10.0
libtpu: 0.0.40
codegen_flags: <defaults>
</compile_context>

<pallas_src>
import functools

import jax
import jax.numpy as jnp
from jax.experimental import pallas as pl
from jax.experimental.pallas import tpu as pltpu


# ---------------------------------------------------------------------------
# Fused single-pass kernel: a (bn, C, HW) batch-block is resident in VMEM.
# ---------------------------------------------------------------------------
def _se_fused_kernel(x_ref, w1_ref, b1_ref, w2_ref, b2_ref, o_ref, *, inv_hw):
    # squeeze: AdaptiveAvgPool2d(1) == f32-accumulated sum over spatial axis * (1/HW)
    pooled = jnp.sum(x_ref[...], axis=-1, dtype=jnp.float32) * inv_hw          # (bn, C)

    # excitation: 1x1 conv -> SiLU -> 1x1 conv -> Sigmoid (all in f32)
    h = jnp.dot(pooled, w1_ref[...].astype(jnp.float32),
                preferred_element_type=jnp.float32) + b1_ref[...].astype(jnp.float32)
    h = h * jax.nn.sigmoid(h)                                                   # SiLU
    g = jnp.dot(h, w2_ref[...].astype(jnp.float32),
                preferred_element_type=jnp.float32) + b2_ref[...].astype(jnp.float32)
    g = jax.nn.sigmoid(g)                                                       # (bn, C)

    # scale: broadcast gate over spatial positions; read x straight from the ref
    o_ref[...] = x_ref[...] * g[:, :, None].astype(o_ref.dtype)


# ---------------------------------------------------------------------------
# Fallback path (one batch element exceeds the block budget):
#   pass 1: pooled sum accumulated over HW chunks, gate computed at last chunk
#   pass 2: streaming gate apply over HW chunks
# ---------------------------------------------------------------------------
def _se_gate_kernel(x_ref, w1_ref, b1_ref, w2_ref, b2_ref, s_ref, acc_ref, *, inv_hw, hw):
    j = pl.program_id(1)

    @pl.when(j == 0)
    def _():
        acc_ref[...] = jnp.zeros_like(acc_ref)

    # Mask out-of-range spatial positions in the (possibly ragged) last chunk:
    # this is a cross-element reduction, so OOB garbage must not leak into the sum.
    chunk = x_ref.shape[-1]
    pos = j * chunk + jax.lax.broadcasted_iota(jnp.int32, x_ref.shape, 2)
    xm = jnp.where(pos < hw, x_ref[...], 0.0)
    acc_ref[...] += jnp.sum(xm, axis=-1, dtype=jnp.float32)                     # (1, C)

    @pl.when(j == pl.num_programs(1) - 1)
    def _():
        pooled = acc_ref[...] * inv_hw                                          # (1, C)
        h = jnp.dot(pooled, w1_ref[...].astype(jnp.float32),
                    preferred_element_type=jnp.float32) + b1_ref[...].astype(jnp.float32)
        h = h * jax.nn.sigmoid(h)                                               # SiLU
        g = jnp.dot(h, w2_ref[...].astype(jnp.float32),
                    preferred_element_type=jnp.float32) + b2_ref[...].astype(jnp.float32)
        s_ref[...] = jax.nn.sigmoid(g)[:, :, None]                              # (1, C, 1)


def _se_scale_kernel(x_ref, s_ref, o_ref):
    # Per-element op: ragged last chunk reads garbage past HW but writes are masked.
    o_ref[...] = x_ref[...] * s_ref[...].astype(x_ref.dtype)


# ---------------------------------------------------------------------------
# Wrapper
# ---------------------------------------------------------------------------
def _vmem_budget(block_budget_bytes):
    """Generation-aware (block budget, vmem_limit_bytes)."""
    vmem = None
    try:
        vmem = getattr(pltpu.get_tpu_info(), "vmem_capacity_bytes", None)
    except Exception:
        vmem = None
    if vmem is None:
        vmem = 64 * 1024 * 1024                      # assume smallest (v7x) if unknown
    if vmem >= 128 * 1024 * 1024:                    # v5e / v6e
        budget, limit = 16 * 1024 * 1024, 64 * 1024 * 1024
    else:                                            # v7x: 64 MiB physical VMEM
        budget, limit = 4 * 1024 * 1024, 32 * 1024 * 1024
    if block_budget_bytes is not None:
        budget = int(block_budget_bytes)
    return budget, limit


def se_forward(x, w1, b1, w2, b2, *, block_budget_bytes=None):
    """x: (N, C, H, W). w1: (C, C_inner), b1: (1, C_inner), w2: (C_inner, C), b2: (1, C)."""
    N, C, H, W = x.shape
    HW = H * W
    inner = w1.shape[1]
    itemsize = jnp.dtype(x.dtype).itemsize
    budget, vmem_limit = _vmem_budget(block_budget_bytes)

    x_flat = x.reshape(N, C, HW)                     # free (contiguous)
    bytes_per_batch = C * HW * itemsize
    inv_hw = 1.0 / HW                                # Python float: baked-in literal

    if bytes_per_batch <= budget:
        # ---------------- fused single-pass path ----------------
        bn = max(1, min(N, budget // max(1, bytes_per_batch)))
        # Guarantee several grid steps when N permits (double-buffering + megacore).
        bn = min(bn, max(1, pl.cdiv(N, 4)))
        grid = (pl.cdiv(N, bn),)                     # ragged final block handled by masking

        kernel = functools.partial(_se_fused_kernel, inv_hw=inv_hw)
        out = pl.pallas_call(
            kernel,
            out_shape=jax.ShapeDtypeStruct((N, C, HW), x.dtype),
            grid=grid,
            in_specs=[
                # Trailing dims equal the full array dims -> no (8,128) padding needed.
                pl.BlockSpec((bn, C, HW), lambda i: (i, 0, 0)),
                # Weights/biases: constant block index -> fetched once, kept resident.
                pl.BlockSpec((C, inner), lambda i: (0, 0)),
                pl.BlockSpec((1, inner), lambda i: (0, 0)),
                pl.BlockSpec((inner, C), lambda i: (0, 0)),
                pl.BlockSpec((1, C), lambda i: (0, 0)),
            ],
            out_specs=pl.BlockSpec((bn, C, HW), lambda i: (i, 0, 0)),
            compiler_params=pltpu.CompilerParams(
                dimension_semantics=("parallel",),   # shards batch loop across TCs on v7x
                vmem_limit_bytes=vmem_limit,
            ),
        )(x_flat, w1, b1, w2, b2)
        return out.reshape(N, C, H, W)

    # ---------------- fallback two-pass path (huge per-batch feature maps) ----------------
    # Lane-dense spatial chunk sized from the budget (multiple of 128, capped at HW).
    chunk = max(128, (budget // max(1, C * itemsize)) // 128 * 128)
    chunk = min(chunk, HW)
    n_chunks = pl.cdiv(HW, chunk)

    gate_kernel = functools.partial(_se_gate_kernel, inv_hw=inv_hw, hw=HW)
    gate = pl.pallas_call(
        gate_kernel,
        out_shape=jax.ShapeDtypeStruct((N, C, 1), jnp.float32),
        grid=(N, n_chunks),
        in_specs=[
            pl.BlockSpec((1, C, chunk), lambda i, j: (i, 0, j)),
            pl.BlockSpec((C, inner), lambda i, j: (0, 0)),
            pl.BlockSpec((1, inner), lambda i, j: (0, 0)),
            pl.BlockSpec((inner, C), lambda i, j: (0, 0)),
            pl.BlockSpec((1, C), lambda i, j: (0, 0)),
        ],
        out_specs=pl.BlockSpec((1, C, 1), lambda i, j: (i, 0, 0)),   # resident across j
        scratch_shapes=[pltpu.VMEM((1, C), jnp.float32)],
        compiler_params=pltpu.CompilerParams(
            dimension_semantics=("parallel", "arbitrary"),
            vmem_limit_bytes=vmem_limit,
        ),
    )(x_flat, w1, b1, w2, b2)

    out = pl.pallas_call(
        _se_scale_kernel,
        out_shape=jax.ShapeDtypeStruct((N, C, HW), x.dtype),
        grid=(N, n_chunks),
        in_specs=[
            pl.BlockSpec((1, C, chunk), lambda i, j: (i, 0, j)),
            pl.BlockSpec((1, C, 1), lambda i, j: (i, 0, 0)),
        ],
        out_specs=pl.BlockSpec((1, C, chunk), lambda i, j: (i, 0, j)),
        compiler_params=pltpu.CompilerParams(
            dimension_semantics=("parallel", "arbitrary"),
            vmem_limit_bytes=vmem_limit,
        ),
    )(x_flat, gate)
    return out.reshape(N, C, H, W)


def se_reference(x, w1, b1, w2, b2):
    """Pure-JAX reference matching the PyTorch forward."""
    pooled = jnp.mean(x, axis=(2, 3))                # (N, C)
    h = pooled @ w1 + b1
    h = h * jax.nn.sigmoid(h)                        # SiLU
    s = jax.nn.sigmoid(h @ w2 + b2)                  # Sigmoid
    return x * s[:, :, None, None]


if __name__ == "__main__":
    # Shapes consistent with the module: SE(outer_channels=4, inner_channels=2)
    N, C_outer, C_inner, H, W = 2, 4, 16, 16, 16
    N, C_outer, C_inner, H, W = 2, 4, 2, 16, 16

    key = jax.random.PRNGKey(0)
    kx, kw1, kb1, kw2, kb2 = jax.random.split(key, 5)

    x = jax.random.normal(kx, (N, C_outer, H, W), dtype=jnp.float32)
    w1 = 0.1 * jax.random.normal(kw1, (C_outer, C_inner), dtype=jnp.float32)
    b1 = 0.1 * jax.random.normal(kb1, (1, C_inner), dtype=jnp.float32)
    w2 = 0.1 * jax.random.normal(kw2, (C_inner, C_outer), dtype=jnp.float32)
    b2 = 0.1 * jax.random.normal(kb2, (1, C_outer), dtype=jnp.float32)

    out = se_forward(x, w1, b1, w2, b2)
    jax.block_until_ready(out)
    ref = se_reference(x, w1, b1, w2, b2)
    assert out.shape == x.shape and out.dtype == x.dtype
    assert jnp.allclose(out, ref, atol=1e-5, rtol=1e-5), "mismatch vs JAX reference"

    # Ragged spatial extent (HW=49) and ragged final batch block (N=5, bn=2 -> 3 grid steps).
    x2 = jax.random.normal(kx, (5, C_outer, 7, 7), dtype=jnp.float32)
    out2 = se_forward(x2, w1, b1, w2, b2)
    jax.block_until_ready(out2)
    ref2 = se_reference(x2, w1, b1, w2, b2)
    assert jnp.allclose(out2, ref2, atol=1e-5, rtol=1e-5), "mismatch vs JAX reference (ragged)"

    # Force the two-pass fallback path (per-batch bytes > budget) with ragged HW chunks.
    x3 = jax.random.normal(kx, (2, C_outer, 16, 25), dtype=jnp.float32)
    out3 = se_forward(x3, w1, b1, w2, b2, block_budget_bytes=2048)
    jax.block_until_ready(out3)
    ref3 = se_reference(x3, w1, b1, w2, b2)
    assert jnp.allclose(out3, ref3, atol=1e-5, rtol=1e-5), "mismatch vs JAX reference (fallback)"

    print("KERNEL_OK")
</pallas_src>

<mosaic_0001>
module attributes {stable_mosaic.version = 11 : i64} {
  func.func @_se_fused_kernel(%arg0: i32, %arg1: memref<1x4x256xf32, #tpu.memory_space<vmem>>, %arg2: memref<4x2xf32, #tpu.memory_space<vmem>>, %arg3: memref<1x2xf32, #tpu.memory_space<vmem>>, %arg4: memref<2x4xf32, #tpu.memory_space<vmem>>, %arg5: memref<1x4xf32, #tpu.memory_space<vmem>>, %arg6: memref<1x4x256xf32, #tpu.memory_space<vmem>>) attributes {dimension_semantics = [#tpu.dimension_semantics<parallel>], iteration_bounds = array<i64: 2>, scalar_prefetch = 0 : i64, scratch_operands = 0 : i64, tpu.core_type = #tpu.core_type<tc>, window_params = [{transform_indices = @transform_0, window_bounds = array<i64: 1, 4, 256>}, {pipeline_mode = #tpu.pipeline_mode<synchronous>, transform_indices = @transform_1, window_bounds = array<i64: 4, 2>}, {pipeline_mode = #tpu.pipeline_mode<synchronous>, transform_indices = @transform_2, window_bounds = array<i64: 1, 2>}, {pipeline_mode = #tpu.pipeline_mode<synchronous>, transform_indices = @transform_3, window_bounds = array<i64: 2, 4>}, {pipeline_mode = #tpu.pipeline_mode<synchronous>, transform_indices = @transform_4, window_bounds = array<i64: 1, 4>}, {transform_indices = @transform_5, window_bounds = array<i64: 1, 4, 256>}]} {
    %c0 = arith.constant 0 : index
    %c0_0 = arith.constant 0 : index
    %c0_1 = arith.constant 0 : index
    %0 = vector.load %arg1[%c0, %c0_0, %c0_1] : memref<1x4x256xf32, #tpu.memory_space<vmem>>, vector<1x4x256xf32>
    %cst = arith.constant dense<0.000000e+00> : vector<1x4xf32>
    %1 = vector.multi_reduction <add>, %0, %cst [2] : vector<1x4x256xf32> to vector<1x4xf32>
    %cst_2 = arith.constant 3.906250e-03 : f32
    %2 = vector.broadcast %cst_2 : f32 to vector<1x4xf32>
    %3 = arith.mulf %1, %2 : vector<1x4xf32>
    %c0_3 = arith.constant 0 : index
    %c0_4 = arith.constant 0 : index
    %4 = vector.load %arg2[%c0_3, %c0_4] : memref<4x2xf32, #tpu.memory_space<vmem>>, vector<4x2xf32>
    %cst_5 = arith.constant dense<0.000000e+00> : vector<1x2xf32>
    %5 = tpu.matmul %3, %4, %cst_5 {dimension_numbers = #tpu.dot_dimension_numbers<[1], [0], [0], [1], [0, 0, 1, 1], [], []>} : vector<1x4xf32>, vector<4x2xf32>, vector<1x2xf32> -> vector<1x2xf32>
    %c0_6 = arith.constant 0 : index
    %c0_7 = arith.constant 0 : index
    %6 = vector.load %arg3[%c0_6, %c0_7] : memref<1x2xf32, #tpu.memory_space<vmem>>, vector<1x2xf32>
    %7 = arith.addf %5, %6 : vector<1x2xf32>
    %8 = arith.negf %7 : vector<1x2xf32>
    %9 = math.exp %8 : vector<1x2xf32>
    %cst_8 = arith.constant 1.000000e+00 : f32
    %10 = vector.broadcast %cst_8 : f32 to vector<1x2xf32>
    %11 = arith.addf %10, %9 : vector<1x2xf32>
    %12 = arith.divf %10, %11 : vector<1x2xf32>
    %13 = arith.mulf %7, %12 : vector<1x2xf32>
    %c0_9 = arith.constant 0 : index
    %c0_10 = arith.constant 0 : index
    %14 = vector.load %arg4[%c0_9, %c0_10] : memref<2x4xf32, #tpu.memory_space<vmem>>, vector<2x4xf32>
    %cst_11 = arith.constant dense<0.000000e+00> : vector<1x4xf32>
    %15 = tpu.matmul %13, %14, %cst_11 {dimension_numbers = #tpu.dot_dimension_numbers<[1], [0], [0], [1], [0, 0, 1, 1], [], []>} : vector<1x2xf32>, vector<2x4xf32>, vector<1x4xf32> -> vector<1x4xf32>
    %c0_12 = arith.constant 0 : index
    %c0_13 = arith.constant 0 : index
    %16 = vector.load %arg5[%c0_12, %c0_13] : memref<1x4xf32, #tpu.memory_space<vmem>>, vector<1x4xf32>
    %17 = arith.addf %15, %16 : vector<1x4xf32>
    %18 = arith.negf %17 : vector<1x4xf32>
    %19 = math.exp %18 : vector<1x4xf32>
    %cst_14 = arith.constant 1.000000e+00 : f32
    %20 = vector.broadcast %cst_14 : f32 to vector<1x4xf32>
    %21 = arith.addf %20, %19 : vector<1x4xf32>
    %22 = arith.divf %20, %21 : vector<1x4xf32>
    %c0_15 = arith.constant 0 : index
    %c0_16 = arith.constant 0 : index
    %c0_17 = arith.constant 0 : index
    %23 = vector.load %arg1[%c0_15, %c0_16, %c0_17] : memref<1x4x256xf32, #tpu.memory_space<vmem>>, vector<1x4x256xf32>
    %24 = vector.shape_cast %22 : vector<1x4xf32> to vector<1x4x1xf32>
    %25 = vector.broadcast %24 : vector<1x4x1xf32> to vector<1x4x256xf32>
    %26 = arith.mulf %23, %25 : vector<1x4x256xf32>
    %c0_18 = arith.constant 0 : index
    %c0_19 = arith.constant 0 : index
    %c0_20 = arith.constant 0 : index
    %27 = vector.load %arg6[%c0_18, %c0_19, %c0_20] : memref<1x4x256xf32, #tpu.memory_space<vmem>>, vector<1x4x256xf32>
    tpu.vector_store %arg6[%c0_18, %c0_19, %c0_20], %26 {strides = array<i32>} : memref<1x4x256xf32, #tpu.memory_space<vmem>>, vector<1x4x256xf32>,
    return
  }
  func.func @transform_0(%arg0: i32) -> (i32, i32, i32) {
    %c0_i32 = arith.constant 0 : i32
    %c0_i32_0 = arith.constant 0 : i32
    %c0_i32_1 = arith.constant 0 : i32
    return %arg0, %c0_i32, %c0_i32_0 : i32, i32, i32
  }
  func.func @transform_1(%arg0: i32) -> (i32, i32) {
    %c0_i32 = arith.constant 0 : i32
    %c0_i32_0 = arith.constant 0 : i32
    %c0_i32_1 = arith.constant 0 : i32
    return %c0_i32, %c0_i32_0 : i32, i32
  }
  func.func @transform_2(%arg0: i32) -> (i32, i32) {
    %c0_i32 = arith.constant 0 : i32
    %c0_i32_0 = arith.constant 0 : i32
    %c0_i32_1 = arith.constant 0 : i32
    return %c0_i32, %c0_i32_0 : i32, i32
  }
  func.func @transform_3(%arg0: i32) -> (i32, i32) {
    %c0_i32 = arith.constant 0 : i32
    %c0_i32_0 = arith.constant 0 : i32
    %c0_i32_1 = arith.constant 0 : i32
    return %c0_i32, %c0_i32_0 : i32, i32
  }
  func.func @transform_4(%arg0: i32) -> (i32, i32) {
    %c0_i32 = arith.constant 0 : i32
    %c0_i32_0 = arith.constant 0 : i32
    %c0_i32_1 = arith.constant 0 : i32
    return %c0_i32, %c0_i32_0 : i32, i32
  }
  func.func @transform_5(%arg0: i32) -> (i32, i32, i32) {
    %c0_i32 = arith.constant 0 : i32
    %c0_i32_0 = arith.constant 0 : i32
    %c0_i32_1 = arith.constant 0 : i32
    return %arg0, %c0_i32, %c0_i32_0 : i32, i32, i32
  }
}

</mosaic_0001>

<bundles_post_ra>
// kernel: tpu_custom_call.1
= control target key start
LH: loop header
LB: loop body
LE: loop exit
PB: predicated region body
PF: predicated region fallthrough
CT: control target
= control target key end

     0   :  { %10 = vsyncpa [#allocation3], 0  ;;  %s913_s0 = inlined_call_operand.hbm [shape: f32[2,4,256], index: 0, kind: input, shape index: {}]   ;;  %s914_s1 = inlined_call_operand.vmem [shape: f32[4,2], index: 1, kind: input, shape index: {}]   ;;  %s915_s2 = inlined_call_operand.vmem [shape: f32[1,2], index: 2, kind: input, shape index: {}]   ;;  %s916_s3 = inlined_call_operand.vmem [shape: f32[2,4], index: 3, kind: input, shape index: {}]   ;;  %s917_s4 = inlined_call_operand.vmem [shape: f32[1,4], index: 4, kind: input, shape index: {}]   ;;  %s918_s5 = inlined_call_operand.hbm [shape: f32[2,4,256], index: 5, kind: output, shape index: {}]  }
   0x1   :  { %12 = vsyncpa [#allocation3 + $0x1], 0 }
   0x2   :  { %13 = vsyncpa [#allocation4], 0 }
   0x3   :  { %15 = vsyncpa [#allocation4 + $0x1], 0  ;;  %s756_s18 = smov 0   ;;  %s758_s19 = smov 0  }
   0x4   :  { %s760_s20 = smov 0   ;;  %s762_s21 = smov 0  }
   0x5 LB: > { %s777_s22 = sadd.s32 4294967295, %s719_s21   ;;  %s533_s23 = sadd.s32 4294967294, %s719_s21   ;;  %s719_s21 = sphi %s762_s21, %s935_s21   ;;  %s715_s20 = sphi %s760_s20, %s934_s20   ;;  %s711_s19 = sphi %s758_s19, %s933_s19   ;;  %s707_s18 = sphi %s756_s18, %s932_s18  }
   0x6   : > { %s781_s24 = sadd.s32 1, %s719_s21   ;;  %s28_s25 = sadd.s32 1, %s715_s20 }
   0x7   : > { %s25_s26 = ssub.s32 %s719_s21, %s781_s24  ;;  %p35_p0 = scmp.ne.s32.totalorder %s715_s20, %s711_s19 }
   0x8   : > { %p26_p1 = scmp.eq.s32.totalorder %s25_s26, 0  ;;  %p36_p2 = scmp.eq.s32.totalorder %s719_s21, 0 }
   0x9   : > { %p41_p3 = scmp.ne.s32.totalorder %s711_s19, %s707_s18  ;;  %p42_p4 = scmp.eq.s32.totalorder %s777_s22, 0 }
   0xa   : > { %s793_s27 = scalar_select %p26_p1, %s715_s20, %s28_s25  }
   0xb   : > { %p795_p5 = por %p36_p2, %p35_p0  ;;  %p799_p6 = por %p42_p4, %p41_p3 }
   0xc   : > { %p149_p7 = scmp.eq.s32.totalorder %s777_s22, 1  ;;  %p155_p8 = scmp.eq.s32.totalorder %s533_s23, 1 }
   0xd   : > { %s922_s29 = scalar_select %p799_p6, 1, 0 }
   0xe   : > { %p581_p10 = scmp.lt.s32.totalorder %s719_s21, 2  ;;  %p806_p11 = por %p149_p7, %p35_p0 }
   0xf   : > { %p810_p12 = por %p155_p8, %p41_p3  ;;  %s187_s7 = sand.u32 1, %s715_s20  }
  0x10   : > { %s923_s30 = scalar_select %p806_p11, 1, 0 }
  0x11   : > { %s924_s6 = scalar_select %p810_p12, 1, 0 }
  0x12   : > { %s553_s8 = sshll.u32 %s719_s21, 7  ;;  %s536_s9 = sshll.u32 %s187_s7, 3 }
  0x13   : > { %s819_s12 = scalar_lea.hbm %s913_s0, %s553_s8  ;;  %s191_s13 = scalar_lea.vmem [#allocation2], %s536_s9 }
  0x14   : > { %s199_s14 = sshll.u32 %s191_s13, 4  ;;  %p823_p13 = pnand %p581_p10, %p795_p5  ;;  %s827_s14 = int_to_ptr.vmem [resolvable:$true] %s199_s14 }
  0x15   : > { %s188_s16 = scalar_lea.sflag [#allocation3], %s187_s7  ;;  %s627_s17 = scalar_lea.hbm %s819_s12, 128 }
  0x16   : > { %p628_p2 = scmp.ne.s32.totalorder %s819_s12, %s627_s17  ;;  %p629_p3 = pneg %p823_p13 }
  0x17   : > { %s632_s26 = scalar_lea.hbm %s913_s0, 256  ;;  %p633_p5 = scmp.lt.s32.totalorder %s819_s12, %s913_s0 }
  0x18   : > { %p630_p4 = pnand %p629_p3, %p628_p2  ;;  %p634_p8 = scmp.lt.s32.totalorder %s632_s26, %s627_s17 }
  0x1a   : > { %p631_p7 = pneg %p630_p4  ;;  %p635_p10 = por %p634_p8, %p633_p5 }
  0x1c   : > { %p636_p9 = pnand %p635_p10, %p631_p7 }
  0x1e   : > { %639 = shalt.err (!%p636_p9)
}
  0x1f   : > { %s640_s7 = scalar_lea.vmem %s827_s14, 128  ;;  %s721_s9 = smov [#allocation2]  }
  0x20   : > { %p641_p0 = scmp.ne.s32.totalorder %s827_s14, %s640_s7  ;;  %s645_s10 = sshll.u32 %s721_s9, 4  ;;  %s646_s10 = int_to_ptr.vmem [resolvable:$false] %s645_s10 }
  0x21   : > { %s647_s11 = scalar_lea.vmem %s646_s10, 256  ;;  %p648_p4 = scmp.lt.s32.totalorder %s827_s14, %s646_s10 }
  0x22   : > { %p643_p1 = pnand %p641_p0, %p629_p3  ;;  %p649_p12 = scmp.lt.s32.totalorder %s647_s11, %s640_s7 }
  0x24   : > { %p644_p2 = pneg %p643_p1  ;;  %p650_p11 = por %p649_p12, %p648_p4 }
  0x26   : > { %p651_p6 = pnand %p650_p11, %p644_p2 }
  0x28   : > { %654 = shalt.err (!%p651_p6)
}
  0x29   : > { %576 = dma.hbm_to_vmem [thread:$0]  (!%p823_p13), %s819_s12, 128, %s827_s14, %s188_s16  }
  0x2a   : > { %p926_p9 = scmp.lt.s32.totalorder %s719_s21, 3  ;;  %p927_p7 = scmp.ge.s32.totalorder %s719_s21, 1 }
  0x2c   : > { %p205_p0 = pnand %p927_p7, %p926_p9 }
  0x2d   : > { %s854_s13 = sand.u32 (!%p205_p0), 1, %s711_s19   ;;  %p928_p6 = scmp.ne.s32.totalorder (!%p205_p0), %s922_s29, 0 }
  0x2e   : > { %208 = sbr.rel (%p205_p0) target bundleno = 790 (0x316), region = 40  ;;  %s540_s17 = sshll.u32 (!%p205_p0), %s854_s13, 3 }
  0x2f   : > { %s211_s23 = scalar_lea.sflag (!%p205_p0), [#allocation3], %s854_s13  ;;  %s214_s15 = scalar_lea.vmem (!%p205_p0), [#allocation2], %s540_s17 }
  0x33   : > { %698 = dma.done.wait (%p928_p6), %s211_s23, 128  }
  0x34   : > { %700 = vsyncadd (%p928_p6), %s211_s23, 4294967168  ;;  %vm245_vm0 = vcmask 1043456   ;;  %v241_v0 = vld [vmem:[%s214_s15] sm:$0xff]  ;;  %v722_v5 = vmov 0.0   ;;  %vm723_vm1 = vmmov 0   ;;  %v255_v7 = vlaneseq  ;;  %s554_s7 = sshll.u32 %s777_s22, 7 }
  0x35   : > { %v243_v1 = vcombine.high %v241_v0, %v241_v0  ;;  %v246_v2 = vsel %vm245_vm0, %v241_v0, 0.0  ;;  %559 = vmatprep.subr.mxu0 %v722_v5  ;;  %v252_v6 = vld [vmem:[%s914_s1] sm:$0xf]  ;;  %564 = vmatprep.subr.mxu1 %v722_v5  ;;  %vm261_vm2 = vcmask 31744   ;;  %vm350_vm3 = vcmask 1041408   ;;  %s240_s9 = scalar_lea.vmem [#allocation5], %s540_s17  ;;  %s461_s15 = scalar_lea.hbm %s918_s5, %s554_s7 }
  0x36   : > { %560 = vmatpush3.msk.msra.mxu0 %vm245_vm0, %v252_v6  ;;  %561 = vmatprep.mubr.msk.f32.mxu0 %vm723_vm1, %v722_v5  ;;  %v256_v8 = vand.u32 127, %v255_v7  ;;  %v258_v9 = vshrl.u32 %v255_v7, 7  ;;  %v344_v14 = vld [vmem:[%s916_s3] sm:$0x3]  ;;  %vm346_vm4 = vcmask 15360   ;;  %s463_s10 = sshll.u32 %s240_s9, 4  ;;  %s464_s10 = int_to_ptr.vmem [resolvable:$true] %s463_s10 }
  0x37   : > { %v247_v3 = vsel %vm245_vm0, %v243_v1, 0.0  ;;  %566 = vmatprep.mubr.msk.f32.mxu1 %vm723_vm1, %v722_v5  ;;  %565 = vmatpush3.msk.msra.mxu1 %vm350_vm3, %v344_v14  ;;  %v253_v15 = vld [vmem:[%s915_s2] sm:$0x1]  ;;  %v724_v34 = vmov 839922192   ;;  %s449_s12 = scalar_lea.sflag [#allocation4], %s854_s13 }
  0x38   : > { %v248_v4 = vadd.f32 %v247_v3, %v246_v2  ;;  %v259_v10 = vsub.s32 %v256_v8, %v258_v9  ;;  %v345_v24 = vld [vmem:[%s917_s4] sm:$0x1]  ;;  %v432_v31 = vsub.s32 0, %v258_v9  ;;  %v439_v35 = vunpack.c.l.s4 %v724_v34  ;;  %s655_s14 = scalar_lea.vmem %s464_s10, 128  ;;  %p929_p12 = scmp.ne.s32.totalorder %s923_s30, 0 }
  0x39   : > { %p656_p11 = scmp.ne.s32.totalorder %s464_s10, %s655_s14  ;;  %s725_s29 = smov [#allocation5]  }
  0x3a   : > { %249 = vadd.xlane.f32.xlu0 %v248_v4  ;;  %v440_v36 = vunpack.c.0.s8 %v439_v35  ;;  %s659_s16 = sshll.u32 %s725_s29, 4  ;;  %s660_s16 = int_to_ptr.vmem [resolvable:$false] %s659_s16 }
  0x3b   : > { %p657_p13 = pnand %p656_p11, %p929_p12  ;;  %s661_s22 = scalar_lea.vmem %s660_s16, 256 }
  0x3c   : > { %v443_v37 = vsub.s32 %v440_v36, %v258_v9  ;;  %p662_p3 = scmp.lt.s32.totalorder %s464_s10, %s660_s16  ;;  %p663_p5 = scmp.lt.s32.totalorder %s661_s22, %s655_s14 }
  0x3d   : > { %p658_p1 = pneg %p657_p13 }
  0x3e   : > { %p664_p8 = por %p663_p5, %p662_p3 }
  0x40   : > { %p665_p10 = pnand %p664_p8, %p658_p1 }
  0xc3   : > { %v250_v11 = vpop.xlane.xlu0 %249 }
  0xc4   : > { %v251_v12 = vmul.f32 0.00390625, %v250_v11 }
  0xc6   : > { %v260_v13 = vrot.slane %v251_v12, %v259_v10 }
  0xc8   : > { %562 = vmatmul.mubr.msk.f32.vlgmr.msra.gmra.mxu0 %vm261_vm2, %v260_v13 }
 0x188   : > { %v333_v16 = vpop.f32.mrf.mxu0 }
 0x189   : > { %v334_v17 = vadd.f32 %v333_v16, %v253_v15 }
 0x18a   : > { %v563_v18 = vpop.f32.mrf.mxu0 }
 0x18b   : > { %v544_v19 = vmul.f32 -1.442695, %v334_v17 }
 0x18d   : > { %619 = vpow2.f32 %v544_v19 }
 0x19a   : > { %v620_v20 = vpop.eup %619 }
 0x19b   : > { %v340_v21 = vadd.f32 1.0, %v620_v20 }
 0x19d   : > { %621 = vrcp.f32 %v340_v21 }
 0x1aa   : > { %v622_v22 = vpop.eup %621 }
 0x1ab   : > { %v343_v23 = vmul.f32 %v622_v22, %v334_v17 }
 0x1ad   : > { %567 = vmatmul.mubr.msk.f32.vlgmr.msra.gmra.mxu1 %vm346_vm4, %v343_v23 }
 0x26d   : > { %v420_v25 = vpop.f32.mrf.mxu1 }
 0x26e   : > { %v421_v26 = vadd.f32 %v420_v25, %v345_v24 }
 0x26f   : > { %v568_v27 = vpop.f32.mrf.mxu1 }
 0x270   : > { %v547_v28 = vmul.f32 -1.442695, %v421_v26 }
 0x272   : > { %623 = vpow2.f32 %v547_v28 }
 0x27f   : > { %v624_v29 = vpop.eup %623 }
 0x280   : > { %v427_v30 = vadd.f32 1.0, %v624_v29 }
 0x282   : > { %625 = vrcp.f32 %v427_v30 }
 0x28f   : > { %v626_v32 = vpop.eup %625 }
 0x290   : > { %v433_v33 = vrot.slane %v626_v32, %v432_v31 }
 0x292   : > { %435 = vbcast.lane.b32.xlu0 %v433_v33, 256 }
 0x304   : > { %v436_v38 = vpop.permute.xlu0 %435 }
 0x305   : > { %v444_v39 = vrot.slane %v436_v38, %v443_v37 }
 0x307   : > { %v446_v40 = vmul.f32 %v444_v39, %v241_v0 }
 0x309   : > { %447 = vst [vmem:[%s240_s9] sm:$0xff] %v446_v40 }
 0x30a   : > { %668 = shalt.err (!%p665_p10)
}
 0x30b   : > { %s669_s17 = scalar_lea.hbm %s461_s15, 128  ;;  %s673_s26 = scalar_lea.hbm %s918_s5, 256 }
 0x30c   : > { %p670_p2 = scmp.ne.s32.totalorder %s461_s15, %s669_s17  ;;  %p674_p7 = scmp.lt.s32.totalorder %s461_s15, %s918_s5 }
 0x30d   : > { %p675_p0 = scmp.lt.s32.totalorder %s673_s26, %s669_s17 }
 0x30e   : > { %p671_p4 = pnand %p670_p2, %p929_p12 }
 0x30f   : > { %p676_p6 = por %p675_p0, %p674_p7 }
 0x310   : > { %p672_p9 = pneg %p671_p4 }
 0x312   : > { %p677_p11 = pnand %p676_p6, %p672_p9 }
 0x314   : > { %680 = shalt.err (!%p677_p11)
}
 0x315   : > { %571 = dma.vmem_to_hbm [thread:$0]  (%p929_p12), %s464_s10, 128, %s461_s15, %s449_s12  }
 0x316 PF: > { %s475_s7 = sand.u32 1, %s707_s18   ;;  %p930_p13 = scmp.ne.s32.totalorder %s924_s6, 0 }
 0x317   : > { %p931_p1 = scmp.ge.s32.totalorder %s719_s21, 2  ;;  %s476_s9 = scalar_lea.sflag [#allocation4], %s475_s7 }
 0x319   : > { %p578_p3 = pnand %p931_p1, %p930_p13 }
 0x31b   : > { %p579_p5 = pneg %p578_p3 }
 0x31d   : > { %702 = dma.done.wait (%p579_p5), %s476_s9, 128  }
 0x31e   : > { %704 = vsyncadd (%p579_p5), %s476_s9, 4294967168  ;;  %p18_p8 = scmp.ge.s32.totalorder %s781_s24, 4   ;;  %s932_s18 = smov %s711_s19 }
 0x31f   : > { %s933_s19 = smov %s715_s20  ;;  %s934_s20 = smov %s793_s27 }
 0x320   : > { %s935_s21 = smov %s781_s24  ;;  %20 = sbr.rel (!%p18_p8) target bundleno = 5 (0x5), region = 85 }
 0x325   :  { %481 = vsyncpa [#allocation3], 1 }
 0x326   :  { %483 = vsyncpa [#allocation3 + $0x1], 1 }
 0x327   :  { %484 = vsyncpa [#allocation4], 1 }
 0x328   :  { %486 = vsyncpa [#allocation4 + $0x1], 1 }

</bundles_post_ra>
